<compile_context>
chip_gen: v6e
topology: v6e:2x2x1
jax: 0.10.0
libtpu: 0.0.40
codegen_flags: <defaults>
</compile_context>

<pallas_src>
import jax
import jax.numpy as jnp
from jax.experimental import pallas as pl
from jax.experimental.pallas import tpu as pltpu


# --------------------------------------------------------------------------
# Stage 1: per-batch precompute  g_x (bf16), a = wa.x (1,N), c = wc.x (1,N)
# --------------------------------------------------------------------------
def _precompute_kernel(x_ref, wg_ref, bg_ref, wa_ref, ba_ref, wc_ref, bc_ref,
                       gx_ref, a_ref, c_ref):
    x = x_ref[...]                                               # (C_in, N) f32
    gx = jnp.dot(wg_ref[...], x.astype(jnp.bfloat16),
                 preferred_element_type=jnp.float32) + bg_ref[...]
    gx_ref[...] = gx.astype(jnp.bfloat16)                        # (g_ch, N)
    # a[i] = wa . x[:, i]   -- VPU multiply + sublane reduce (no M=1 MXU pass)
    a_ref[...] = (jnp.sum(x * wa_ref[...], axis=0, keepdims=True)
                  + ba_ref[...])                                  # (1, N)
    # c[j] = wc . x[:, j]
    c_ref[...] = (jnp.sum(x * wc_ref[...], axis=0, keepdims=True)
                  + bc_ref[...])                                  # (1, N)


# --------------------------------------------------------------------------
# Stage 2: transposed attention tile
#   attT[j, i] = softmax_j(leakyrelu(a[i] + c[j])) + C_k^T[j, i]
#   out[:, i]  = g_x @ attT      -> (g_ch, TQ), already in NCW layout
# --------------------------------------------------------------------------
def _attention_kernel(gx_ref, a_ref, ct_ref, ckt_ref, out_ref):
    ft = ct_ref[...] + a_ref[...]                                 # (N, TQ)
    ft = jnp.maximum(ft, 0.2 * ft)                                # LeakyReLU(0.2)
    m = jnp.max(ft, axis=0, keepdims=True)                        # (1, TQ)
    e = jnp.exp(ft - m)
    s = jnp.sum(e, axis=0, keepdims=True)                         # (1, TQ)
    att_t = e * pl.reciprocal(s, approx=True) \
        + ckt_ref[...].astype(jnp.float32)                        # (N, TQ) f32
    out_ref[...] = jnp.dot(gx_ref[...], att_t.astype(jnp.bfloat16),
                           preferred_element_type=jnp.float32
                           ).astype(out_ref.dtype)


# --------------------------------------------------------------------------
# Tiling / VMEM budgeting helpers
# --------------------------------------------------------------------------
def _attention_vmem_bytes(n, tq, g_ch):
    """Live VMEM of the attention kernel (double-buffered blocks + temps)."""
    dbuf = 2 * (g_ch * n * 2        # gx (bf16), full per batch
                + 8 * tq * 4        # a (1, TQ), sublane-padded to 8
                + n * 128 * 4       # c column (N, 1), lane-padded to 128
                + n * tq * 2        # C_k^T tile (bf16)
                + g_ch * tq * 4)    # output tile (f32)
    tmp = 4 * n * tq * 4            # ft / e / att_t f32 temporaries + slack
    return dbuf + tmp


def _pick_tq(n, g_ch, tq=None, budget=40 * 1024 * 1024):
    if tq is not None:
        assert n % tq == 0 and (tq == n or tq % 128 == 0)
        return tq
    if n % 128 != 0:
        return n                    # block dims must equal full dim or be /128
    for cand in (512, 256, 128):
        if n % cand == 0 and _attention_vmem_bytes(n, cand, g_ch) <= budget:
            return cand
    return 128


# --------------------------------------------------------------------------
# Host wrapper
# --------------------------------------------------------------------------
def prepare_kernel_params(params):
    """One-time fold of concat_project into theta/phi + dtype/layout prep."""
    wg, bg, wt, bt, wp, bp, wct, wcp, ck = params
    # f[i, j] = wct.(Wt x_i + bt) + wcp.(Wp x_j + bp) = a[i] + c[j]
    wa = (wct @ wt).T                                  # (C_in, 1)
    ba = wct @ bt                                      # (1, 1)
    wc = (wcp @ wp).T                                  # (C_in, 1)
    bc = wcp @ bp                                      # (1, 1)
    ckt = jnp.asarray(ck.T, jnp.bfloat16)              # pre-transposed, bf16
    wg_bf16 = jnp.asarray(wg, jnp.bfloat16)
    return dict(wg=wg_bf16, bg=bg, wa=wa, ba=ba, wc=wc, bc=bc, ckt=ckt)


def global_part_forward(x, kparams, tq=None):
    """x: (B, C_in, N) float32.  Returns (B, g_ch, N) float32."""
    B, C_in, N = x.shape
    wg, bg = kparams["wg"], kparams["bg"]
    wa, ba = kparams["wa"], kparams["ba"]
    wc, bc = kparams["wc"], kparams["bc"]
    ckt = kparams["ckt"]
    g_ch = wg.shape[0]

    const = lambda shape: pl.BlockSpec(shape, lambda b: (0,) * len(shape))

    # ---- stage 1: per-batch precompute (grid = (B,)) ---------------------
    gx, a, c = pl.pallas_call(
        _precompute_kernel,
        out_shape=(jax.ShapeDtypeStruct((B, g_ch, N), jnp.bfloat16),
                   jax.ShapeDtypeStruct((B, 1, N), jnp.float32),
                   jax.ShapeDtypeStruct((B, 1, N), jnp.float32)),
        grid_spec=pltpu.PrefetchScalarGridSpec(
            num_scalar_prefetch=0,
            grid=(B,),
            in_specs=[
                pl.BlockSpec((pl.Squeezed(), C_in, N), lambda b: (b, 0, 0)),  # x
                const((g_ch, C_in)),      # Wg (bf16)
                const((g_ch, 1)),         # bg
                const((C_in, 1)),         # wa (folded theta half)
                const((1, 1)),            # ba
                const((C_in, 1)),         # wc (folded phi half)
                const((1, 1)),            # bc
            ],
            out_specs=[
                pl.BlockSpec((pl.Squeezed(), g_ch, N), lambda b: (b, 0, 0)),
                pl.BlockSpec((pl.Squeezed(), 1, N), lambda b: (b, 0, 0)),
                pl.BlockSpec((pl.Squeezed(), 1, N), lambda b: (b, 0, 0)),
            ],
        ),
        compiler_params=pltpu.CompilerParams(
            dimension_semantics=("parallel",)),
    )(x, wg, bg, wa, ba, wc, bc)

    # Layout plumbing only: c as a (N, 1) column per batch for the
    # transposed attention formulation (B*N*4 bytes, negligible).
    ct = jnp.transpose(c, (0, 2, 1))                               # (B, N, 1)

    # ---- stage 2: attention, tiled over query columns --------------------
    TQ = _pick_tq(N, g_ch, tq)
    nq = N // TQ

    est = _attention_vmem_bytes(N, TQ, g_ch)
    # 48 MiB cap keeps the same tile choice valid on v7x (64 MiB physical).
    vmem_limit = int(min(max(2 * est, 32 * 1024 * 1024), 48 * 1024 * 1024))

    out = pl.pallas_call(
        _attention_kernel,
        out_shape=jax.ShapeDtypeStruct((B, g_ch, N), jnp.float32),
        grid_spec=pltpu.PrefetchScalarGridSpec(
            num_scalar_prefetch=0,
            # Query tiles OUTER, batch INNER: each C_k^T tile keeps a constant
            # block index across the batch loop -> DMA'd once, not B times.
            grid=(nq, B),
            in_specs=[
                pl.BlockSpec((pl.Squeezed(), g_ch, N), lambda q, b: (b, 0, 0)),  # g_x
                pl.BlockSpec((pl.Squeezed(), 1, TQ), lambda q, b: (b, 0, q)),    # a tile
                pl.BlockSpec((pl.Squeezed(), N, 1), lambda q, b: (b, 0, 0)),     # c column
                pl.BlockSpec((N, TQ), lambda q, b: (0, q)),                      # C_k^T tile
            ],
            out_specs=pl.BlockSpec((pl.Squeezed(), g_ch, TQ),
                                   lambda q, b: (b, 0, q)),
        ),
        compiler_params=pltpu.CompilerParams(
            dimension_semantics=("parallel", "parallel"),
            vmem_limit_bytes=vmem_limit,
        ),
    )(gx, a, ct, ckt)
    return out


# --------------------------------------------------------------------------
# Params init (mirrors the PyTorch module) and pure-JAX reference
# --------------------------------------------------------------------------
def init_params(key, in_channels, inter_channels, N):
    if inter_channels == in_channels // 2:
        g_channels = in_channels
    else:
        g_channels = inter_channels

    k = jax.random.split(key, 4)

    def kaiming(k_, shape, fan_in):
        return jax.random.normal(k_, shape, jnp.float32) * jnp.sqrt(2.0 / fan_in)

    wg = kaiming(k[0], (g_channels, in_channels), in_channels)          # g.weight
    bg = jnp.zeros((g_channels, 1), jnp.float32)                        # g.bias
    wt = kaiming(k[1], (inter_channels, in_channels), in_channels)      # theta.weight
    bt = jnp.zeros((inter_channels, 1), jnp.float32)                    # theta.bias
    wp = kaiming(k[2], (inter_channels, in_channels), in_channels)      # phi.weight
    bp = jnp.zeros((inter_channels, 1), jnp.float32)                    # phi.bias
    wcat = kaiming(k[3], (1, 2 * inter_channels), 2 * inter_channels)   # concat_project
    wct = wcat[:, :inter_channels]
    wcp = wcat[:, inter_channels:]
    ck = jnp.zeros((N, N), jnp.float32)                                 # C_k
    return (wg, bg, wt, bt, wp, bp, wct, wcp, ck), g_channels


def reference_forward(x, params):
    """Pure-JAX f32 reference reproducing the PyTorch forward."""
    wg, bg, wt, bt, wp, bp, wct, wcp, ck = params
    g_x = jnp.einsum('oc,bcn->bon', wg, x) + bg[None]                   # (B, g_ch, N)
    g_x = jnp.transpose(g_x, (0, 2, 1))                                 # (B, N, g_ch)
    theta = jnp.einsum('oc,bcn->bon', wt, x) + bt[None]
    phi = jnp.einsum('oc,bcn->bon', wp, x) + bp[None]
    a = jnp.einsum('oi,bin->bn', wct, theta)                            # (B, N)
    c = jnp.einsum('oi,bin->bn', wcp, phi)                              # (B, N)
    f = a[:, :, None] + c[:, None, :]                                   # (B, N, N)
    att = jnp.where(f >= 0.0, f, 0.2 * f)                               # LeakyReLU(0.2)
    att = jax.nn.softmax(att, axis=-1) + ck[None]
    y = jnp.matmul(att, g_x)                                            # (B, N, g_ch)
    return jnp.transpose(y, (0, 2, 1))                                  # (B, g_ch, N)


if __name__ == "__main__":
    def run_case(B, C_in, N, inter, key):
        kx, kp, kc = jax.random.split(key, 3)
        x = jax.random.normal(kx, (B, C_in, N), jnp.float32)
        params, g_ch = init_params(kp, C_in, inter, N)
        # Small non-zero C_k so the "+ C_k" path is actually exercised.
        wg, bg, wt, bt, wp, bp, wct, wcp, _ = params
        ck = 0.01 * jax.random.normal(kc, (N, N), jnp.float32)
        params = (wg, bg, wt, bt, wp, bp, wct, wcp, ck)

        kparams = prepare_kernel_params(params)
        out = jax.block_until_ready(global_part_forward(x, kparams))
        ref = reference_forward(x, params)
        assert out.shape == (B, g_ch, N)
        # bf16 operands on the MXU matmuls + approx reciprocal -> relaxed tol.
        assert jnp.allclose(out, ref, atol=2e-2, rtol=2e-2), \
            f"mismatch vs reference (B={B}, C_in={C_in}, N={N})"

    key = jax.random.PRNGKey(0)
    k1, k2 = jax.random.split(key)
    # Small case: single query tile (TQ == N), full-dim blocks.
    run_case(B=2, C_in=8, N=16, inter=4, key=k1)
    # Tiled case: N=384 -> TQ=128, nq=3; exercises the multi-tile grid and the
    # C_k^T tile reuse across the (inner) batch axis.
    run_case(B=2, C_in=8, N=384, inter=4, key=k2)

    print("KERNEL_OK")
</pallas_src>

<mosaic_0001>
module attributes {stable_mosaic.version = 11 : i64} {
  func.func @_precompute_kernel(%arg0: i32, %arg1: memref<1x8x16xf32, #tpu.memory_space<vmem>>, %arg2: memref<8x8xbf16, #tpu.memory_space<vmem>>, %arg3: memref<8x1xf32, #tpu.memory_space<vmem>>, %arg4: memref<8x1xf32, #tpu.memory_space<vmem>>, %arg5: memref<1x1xf32, #tpu.memory_space<vmem>>, %arg6: memref<8x1xf32, #tpu.memory_space<vmem>>, %arg7: memref<1x1xf32, #tpu.memory_space<vmem>>, %arg8: memref<1x8x16xbf16, #tpu.memory_space<vmem>>, %arg9: memref<1x1x16xf32, #tpu.memory_space<vmem>>, %arg10: memref<1x1x16xf32, #tpu.memory_space<vmem>>) attributes {dimension_semantics = [#tpu.dimension_semantics<parallel>], iteration_bounds = array<i64: 2>, scalar_prefetch = 0 : i64, scratch_operands = 0 : i64, tpu.core_type = #tpu.core_type<tc>, window_params = [{transform_indices = @transform_0, window_bounds = array<i64: 1, 8, 16>}, {pipeline_mode = #tpu.pipeline_mode<synchronous>, transform_indices = @transform_1, window_bounds = array<i64: 8, 8>}, {pipeline_mode = #tpu.pipeline_mode<synchronous>, transform_indices = @transform_2, window_bounds = array<i64: 8, 1>}, {pipeline_mode = #tpu.pipeline_mode<synchronous>, transform_indices = @transform_3, window_bounds = array<i64: 8, 1>}, {pipeline_mode = #tpu.pipeline_mode<synchronous>, transform_indices = @transform_4, window_bounds = array<i64: 1, 1>}, {pipeline_mode = #tpu.pipeline_mode<synchronous>, transform_indices = @transform_5, window_bounds = array<i64: 8, 1>}, {pipeline_mode = #tpu.pipeline_mode<synchronous>, transform_indices = @transform_6, window_bounds = array<i64: 1, 1>}, {transform_indices = @transform_7, window_bounds = array<i64: 1, 8, 16>}, {transform_indices = @transform_8, window_bounds = array<i64: 1, 1, 16>}, {transform_indices = @transform_9, window_bounds = array<i64: 1, 1, 16>}]} {
    %c0 = arith.constant 0 : index
    %c0_0 = arith.constant 0 : index
    %c0_1 = arith.constant 0 : index
    %0 = vector.load %arg1[%c0, %c0_0, %c0_1] : memref<1x8x16xf32, #tpu.memory_space<vmem>>, vector<1x8x16xf32>
    %1 = vector.shape_cast %0 : vector<1x8x16xf32> to vector<8x16xf32>
    %c0_2 = arith.constant 0 : index
    %c0_3 = arith.constant 0 : index
    %2 = vector.load %arg2[%c0_2, %c0_3] : memref<8x8xbf16, #tpu.memory_space<vmem>>, vector<8x8xbf16>
    %3 = arith.truncf %1 : vector<8x16xf32> to vector<8x16xbf16>
    %cst = arith.constant dense<0.000000e+00> : vector<8x16xf32>
    %4 = tpu.matmul %2, %3, %cst {dimension_numbers = #tpu.dot_dimension_numbers<[1], [0], [0], [1], [0, 0, 1, 1], [], []>} : vector<8x8xbf16>, vector<8x16xbf16>, vector<8x16xf32> -> vector<8x16xf32>
    %c0_4 = arith.constant 0 : index
    %c0_5 = arith.constant 0 : index
    %5 = vector.load %arg3[%c0_4, %c0_5] : memref<8x1xf32, #tpu.memory_space<vmem>>, vector<8x1xf32>
    %6 = vector.broadcast %5 : vector<8x1xf32> to vector<8x16xf32>
    %7 = arith.addf %4, %6 : vector<8x16xf32>
    %8 = arith.truncf %7 : vector<8x16xf32> to vector<8x16xbf16>
    %c0_6 = arith.constant 0 : index
    %c0_7 = arith.constant 0 : index
    %c0_8 = arith.constant 0 : index
    %9 = vector.load %arg8[%c0_6, %c0_7, %c0_8] : memref<1x8x16xbf16, #tpu.memory_space<vmem>>, vector<1x8x16xbf16>
    %10 = vector.shape_cast %9 : vector<1x8x16xbf16> to vector<8x16xbf16>
    %11 = vector.shape_cast %8 : vector<8x16xbf16> to vector<1x8x16xbf16>
    tpu.vector_store %arg8[%c0_6, %c0_7, %c0_8], %11 {strides = array<i32>} : memref<1x8x16xbf16, #tpu.memory_space<vmem>>, vector<1x8x16xbf16>,
    %c0_9 = arith.constant 0 : index
    %c0_10 = arith.constant 0 : index
    %12 = vector.load %arg4[%c0_9, %c0_10] : memref<8x1xf32, #tpu.memory_space<vmem>>, vector<8x1xf32>
    %13 = vector.broadcast %12 : vector<8x1xf32> to vector<8x16xf32>
    %14 = arith.mulf %1, %13 : vector<8x16xf32>
    %cst_11 = arith.constant dense<0.000000e+00> : vector<16xf32>
    %15 = vector.multi_reduction <add>, %14, %cst_11 [0] : vector<8x16xf32> to vector<16xf32>
    %16 = vector.shape_cast %15 : vector<16xf32> to vector<1x16xf32>
    %c0_12 = arith.constant 0 : index
    %c0_13 = arith.constant 0 : index
    %17 = vector.load %arg5[%c0_12, %c0_13] : memref<1x1xf32, #tpu.memory_space<vmem>>, vector<1x1xf32>
    %18 = vector.broadcast %17 : vector<1x1xf32> to vector<1x16xf32>
    %19 = arith.addf %16, %18 : vector<1x16xf32>
    %c0_14 = arith.constant 0 : index
    %c0_15 = arith.constant 0 : index
    %c0_16 = arith.constant 0 : index
    %20 = vector.load %arg9[%c0_14, %c0_15, %c0_16] : memref<1x1x16xf32, #tpu.memory_space<vmem>>, vector<1x1x16xf32>
    %21 = vector.shape_cast %20 : vector<1x1x16xf32> to vector<1x16xf32>
    %22 = vector.shape_cast %19 : vector<1x16xf32> to vector<1x1x16xf32>
    tpu.vector_store %arg9[%c0_14, %c0_15, %c0_16], %22 {strides = array<i32>} : memref<1x1x16xf32, #tpu.memory_space<vmem>>, vector<1x1x16xf32>,
    %c0_17 = arith.constant 0 : index
    %c0_18 = arith.constant 0 : index
    %23 = vector.load %arg6[%c0_17, %c0_18] : memref<8x1xf32, #tpu.memory_space<vmem>>, vector<8x1xf32>
    %24 = vector.broadcast %23 : vector<8x1xf32> to vector<8x16xf32>
    %25 = arith.mulf %1, %24 : vector<8x16xf32>
    %cst_19 = arith.constant dense<0.000000e+00> : vector<16xf32>
    %26 = vector.multi_reduction <add>, %25, %cst_19 [0] : vector<8x16xf32> to vector<16xf32>
    %27 = vector.shape_cast %26 : vector<16xf32> to vector<1x16xf32>
    %c0_20 = arith.constant 0 : index
    %c0_21 = arith.constant 0 : index
    %28 = vector.load %arg7[%c0_20, %c0_21] : memref<1x1xf32, #tpu.memory_space<vmem>>, vector<1x1xf32>
    %29 = vector.broadcast %28 : vector<1x1xf32> to vector<1x16xf32>
    %30 = arith.addf %27, %29 : vector<1x16xf32>
    %c0_22 = arith.constant 0 : index
    %c0_23 = arith.constant 0 : index
    %c0_24 = arith.constant 0 : index
    %31 = vector.load %arg10[%c0_22, %c0_23, %c0_24] : memref<1x1x16xf32, #tpu.memory_space<vmem>>, vector<1x1x16xf32>
    %32 = vector.shape_cast %31 : vector<1x1x16xf32> to vector<1x16xf32>
    %33 = vector.shape_cast %30 : vector<1x16xf32> to vector<1x1x16xf32>
    tpu.vector_store %arg10[%c0_22, %c0_23, %c0_24], %33 {strides = array<i32>} : memref<1x1x16xf32, #tpu.memory_space<vmem>>, vector<1x1x16xf32>,
    return
  }
  func.func @transform_0(%arg0: i32) -> (i32, i32, i32) {
    %c0_i32 = arith.constant 0 : i32
    %c0_i32_0 = arith.constant 0 : i32
    %c0_i32_1 = arith.constant 0 : i32
    return %arg0, %c0_i32, %c0_i32_0 : i32, i32, i32
  }
  func.func @transform_1(%arg0: i32) -> (i32, i32) {
    %c0_i32 = arith.constant 0 : i32
    %c0_i32_0 = arith.constant 0 : i32
    %c0_i32_1 = arith.constant 0 : i32
    return %c0_i32, %c0_i32_0 : i32, i32
  }
  func.func @transform_2(%arg0: i32) -> (i32, i32) {
    %c0_i32 = arith.constant 0 : i32
    %c0_i32_0 = arith.constant 0 : i32
    %c0_i32_1 = arith.constant 0 : i32
    return %c0_i32, %c0_i32_0 : i32, i32
  }
  func.func @transform_3(%arg0: i32) -> (i32, i32) {
    %c0_i32 = arith.constant 0 : i32
    %c0_i32_0 = arith.constant 0 : i32
    %c0_i32_1 = arith.constant 0 : i32
    return %c0_i32, %c0_i32_0 : i32, i32
  }
  func.func @transform_4(%arg0: i32) -> (i32, i32) {
    %c0_i32 = arith.constant 0 : i32
    %c0_i32_0 = arith.constant 0 : i32
    %c0_i32_1 = arith.constant 0 : i32
    return %c0_i32, %c0_i32_0 : i32, i32
  }
  func.func @transform_5(%arg0: i32) -> (i32, i32) {
    %c0_i32 = arith.constant 0 : i32
    %c0_i32_0 = arith.constant 0 : i32
    %c0_i32_1 = arith.constant 0 : i32
    return %c0_i32, %c0_i32_0 : i32, i32
  }
  func.func @transform_6(%arg0: i32) -> (i32, i32) {
    %c0_i32 = arith.constant 0 : i32
    %c0_i32_0 = arith.constant 0 : i32
    %c0_i32_1 = arith.constant 0 : i32
    return %c0_i32, %c0_i32_0 : i32, i32
  }
  func.func @transform_7(%arg0: i32) -> (i32, i32, i32) {
    %c0_i32 = arith.constant 0 : i32
    %c0_i32_0 = arith.constant 0 : i32
    %c0_i32_1 = arith.constant 0 : i32
    return %arg0, %c0_i32, %c0_i32_0 : i32, i32, i32
  }
  func.func @transform_8(%arg0: i32) -> (i32, i32, i32) {
    %c0_i32 = arith.constant 0 : i32
    %c0_i32_0 = arith.constant 0 : i32
    %c0_i32_1 = arith.constant 0 : i32
    return %arg0, %c0_i32, %c0_i32_0 : i32, i32, i32
  }
  func.func @transform_9(%arg0: i32) -> (i32, i32, i32) {
    %c0_i32 = arith.constant 0 : i32
    %c0_i32_0 = arith.constant 0 : i32
    %c0_i32_1 = arith.constant 0 : i32
    return %arg0, %c0_i32, %c0_i32_0 : i32, i32, i32
  }
}

</mosaic_0001>

<bundles_post_ra>
// kernel: tpu_custom_call.1
= control target key start
LH: loop header
LB: loop body
LE: loop exit
PB: predicated region body
PF: predicated region fallthrough
CT: control target
= control target key end

     0   :  { %s1060_s0 = inlined_call_operand.vmem [shape: f32[2,8,16], index: 0, kind: input, shape index: {}]   ;;  %s1061_s1 = inlined_call_operand.vmem [shape: bf16[8,8], index: 1, kind: input, shape index: {}]   ;;  %s1062_s2 = inlined_call_operand.vmem [shape: f32[8,1], index: 2, kind: input, shape index: {}]   ;;  %s1063_s3 = inlined_call_operand.vmem [shape: f32[8,1], index: 3, kind: input, shape index: {}]   ;;  %s1064_s4 = inlined_call_operand.<no memory space> [shape: f32[1,1], index: 4, kind: input, shape index: {}]   ;;  %s1065_s5 = inlined_call_operand.vmem [shape: f32[8,1], index: 5, kind: input, shape index: {}]   ;;  %s1066_s7 = inlined_call_operand.hbm [shape: bf16[2,8,16], index: 7, kind: output, shape index: {0}]   ;;  %s1067_s8 = inlined_call_operand.hbm [shape: f32[2,1,16], index: 8, kind: output, shape index: {1}]   ;;  %s1068_s9 = inlined_call_operand.hbm [shape: f32[2,1,16], index: 9, kind: output, shape index: {2}]   ;;  %s1069_s6 = inlined_call_operand.<no memory space> [shape: f32[1,1], index: 6, kind: input, shape index: {}]  }
   0x1   :  { %v15_v0 = vstv %s1064_s4  ;;  %v17_v1 = vstv %s1069_s6 }
   0x2   :  { %16 = vst [vmem:[#allocation2] sm:$0x1] %v15_v0  ;;  %18 = vst [vmem:[#allocation3] sm:$0x1] %v17_v1 }
   0x3   :  { %19 = vsyncpa [#allocation5], 0 }
   0x4   :  { %21 = vsyncpa [#allocation5 + $0x1], 0 }
   0x5   :  { %22 = vsyncpa [#allocation7], 0 }
   0x6   :  { %24 = vsyncpa [#allocation7 + $0x1], 0  ;;  %s878_s13 = smov 0   ;;  %s880_s14 = smov 0  }
   0x7   :  { %s882_s15 = smov 0   ;;  %s884_s16 = smov 0  }
   0x8 LB: > { %s899_s4 = sadd.s32 4294967295, %s814_s16   ;;  %s1070_s6 = sadd.s32 4294967294, %s814_s16   ;;  %s814_s16 = sphi %s884_s16, %s1081_s16   ;;  %s810_s15 = sphi %s882_s15, %s1080_s15   ;;  %s806_s14 = sphi %s880_s14, %s1079_s14   ;;  %s802_s13 = sphi %s878_s13, %s1078_s13  }
   0x9   : > { %s903_s17 = sadd.s32 1, %s814_s16   ;;  %s189_s18 = sadd.s32 1, %s810_s15 }
   0xa   : > { %s186_s19 = ssub.s32 %s814_s16, %s903_s17  ;;  %p199_p0 = scmp.ne.s32.totalorder %s810_s15, %s806_s14 }
   0xb   : > { %p187_p1 = scmp.eq.s32.totalorder %s186_s19, 0  ;;  %p200_p2 = scmp.eq.s32.totalorder %s899_s4, 1 }
   0xc   : > { %p205_p3 = scmp.ne.s32.totalorder %s806_s14, %s802_s13  ;;  %p206_p4 = scmp.eq.s32.totalorder %s1070_s6, 1 }
   0xd   : > { %s916_s20 = scalar_select %p187_p1, %s810_s15, %s189_s18  }
   0xe   : > { %p918_p5 = por %p200_p2, %p199_p0  ;;  %p922_p6 = por %p206_p4, %p205_p3 }
   0xf   : > { %p626_p7 = scmp.ge.s32.totalorder %s814_s16, 1  ;;  %p301_p8 = scmp.lt.s32.totalorder %s814_s16, 3 }
  0x11   : > { %p302_p9 = pnand %p626_p7, %p301_p8 }
  0x12   : > { %p344_p10 = scmp.lt.s32.totalorder (!%p302_p9), %s899_s4, 1  ;;  %s946_s23 = sand.u32 (!%p302_p9), 1, %s806_s14  }
  0x13   : > { %305 = sbr.rel (%p302_p9) target bundleno = 246 (0xf6), region = 48  ;;  %s468_s24 = sand.u32 (!%p302_p9), 1, %s899_s4  }
  0x14   : > { %s1071_s10 = scalar_lea.vmem (!%p302_p9), [#allocation8], %s946_s23  ;;  %s819_s19 = smov (!%p302_p9), [#allocation6]  }
  0x15   : > { %s963_s11 = sshll.u32 (!%p302_p9), %s1071_s10, 4  ;;  %s702_s28 = sshll.u32 (!%p302_p9), %s819_s19, 4  ;;  %s703_s28 = int_to_ptr.vmem [resolvable:$false] %s702_s28  ;;  %s512_s11 = int_to_ptr.vmem [resolvable:$true] %s963_s11 }
  0x16   : > { %s704_s29 = scalar_lea.vmem (!%p302_p9), %s703_s28, 32 }
  0x18   : > { %v816_v2 = vmov 0.0   ;;  %vm817_vm0 = vmmov 0   ;;  %v409_v3 = vld [vmem:[%s1063_s3] sm:$0xff]  ;;  %s345_s25 = scalar_select %p344_p10, %s899_s4, 1  ;;  %v818_v4 = vmov 0   ;;  %vm362_vm1 = vcmask 1043456  }
  0x19   : > { %638 = vmatprep.subr.bf16.mxu0 %v816_v2  ;;  %640 = vmatprep.mubr.msk.bf16.mxu0 %vm817_vm0, %v816_v2  ;;  %v424_v5 = vld [vmem:[#allocation2] sm:$0x1]  ;;  %v451_v10 = vld [vmem:[#allocation3] sm:$0x1]  ;;  %vm358_vm2 = vcmask 64512   ;;  %vm416_vm3 = vcmask 130048   ;;  %v430_v15 = vlaneseq }
  0x1a   : > { %696 = vset.pattern.permute.xlu0 %v818_v4  ;;  %697 = vset.pattern.permute.xlu1 %v818_v4  ;;  %s628_s26 = sshll.u32 %s345_s25, 3  ;;  %v437_v6 = vld [vmem:[%s1065_s5] sm:$0xff]  ;;  %s1072_s25 = sshll.u32 %s899_s4, 4  ;;  %vm435_vm4 = vcmask 122880  }
  0x1b   : > { %412 = vperm.xlu0 %696, %v409_v3   ;;  %427 = vperm.xlu1 %697, %v424_v5   ;;  %v352_v7 = vld [vmem:[%s1062_s2] sm:$0xff]  ;;  %s347_s12 = scalar_lea.vmem %s1060_s0, %s628_s26  ;;  %v431_v21 = vshrl.u32 %v430_v15, 7  ;;  %s337_s26 = scalar_lea.vmem [#allocation6], %s946_s23 }
  0x1c   : > { %v349_v8 = vld [vmem:[%s347_s12] sm:$0xff]  ;;  %s498_s27 = sshll.u32 %s337_s26, 4  ;;  %s956_s30 = scalar_lea.hbm %s1067_s8, %s1072_s25  ;;  %s958_s27 = int_to_ptr.vmem [resolvable:$true] %s498_s27 }
  0x1d   : > { %v351_v9 = vpack.c.bf16 %v349_v8, %v349_v8  ;;  %v350_v12 = vld [vmem:[%s1061_s1] sm:$0xf]  ;;  %v432_v28 = vsub.s32 0, %v431_v21  ;;  %s966_s12 = scalar_lea.sflag [#allocation7], %s468_s24  ;;  %s698_s18 = scalar_lea.vmem %s958_s27, 16 }
  0x1e   : > { %p699_p11 = scmp.ne.s32.totalorder %s958_s27, %s698_s18  ;;  %p705_p0 = scmp.lt.s32.totalorder %s958_s27, %s703_s28 }
  0x1f   : > { %440 = vperm.xlu0 %696, %v437_v6   ;;  %355 = vperm.xlu1 %697, %v352_v7   ;;  %v364_v11 = vsel %vm362_vm1, %v351_v9, 0  ;;  %p706_p1 = scmp.lt.s32.totalorder %s704_s29, %s698_s18 }
  0x20   : > { %639 = vmatpush3.bf16.msra.mxu0 %v364_v11  ;;  %p700_p12 = pnand %p699_p11, %p918_p5 }
  0x21   : > { %p707_p2 = por %p706_p1, %p705_p0 }
  0x22   : > { %p701_p13 = pneg %p700_p12 }
  0x23   : > { %454 = vperm.xlu0 %696, %v451_v10   ;;  %641 = vmatmul.mubr.msk.bf16.vlgmr.msra.gmra.mxu0 %vm358_vm2, %v350_v12 }
  0x24   : > { %p708_p3 = pnand %p707_p2, %p701_p13 }
  0x96   : > { %v413_v13 = vpop.permute.xlu0 %412  ;;  %v428_v25 = vpop.permute.xlu1 %427 }
  0x97   : > { %v415_v14 = vmul.f32 %v413_v13, %v349_v8  ;;  %v433_v31 = vrot.slane %v428_v25, %v432_v28 }
  0x99   : > { %v417_v16 = vsel %vm416_vm3, %v415_v14, 0.0 }
  0x9a   : > { %v418_v17 = vrot.slane %v417_v16, 4  ;;  %v441_v18 = vpop.permute.xlu0 %440 }
  0x9b   : > { %v443_v19 = vmul.f32 %v441_v18, %v349_v8 }
  0x9c   : > { %v419_v20 = vadd.f32 %v418_v17, %v417_v16 }
  0x9d   : > { %v444_v22 = vsel %vm416_vm3, %v443_v19, 0.0 }
  0x9e   : > { %v420_v23 = vrot.slane %v419_v20, 2  ;;  %v445_v24 = vrot.slane %v444_v22, 4  ;;  %v455_v32 = vpop.permute.xlu0 %454 }
  0x9f   : > { %v460_v36 = vrot.slane %v455_v32, %v432_v28 }
  0xa0   : > { %v421_v26 = vadd.f32 %v420_v23, %v419_v20  ;;  %v446_v27 = vadd.f32 %v445_v24, %v444_v22 }
  0xa2   : > { %v447_v29 = vrot.slane %v446_v27, 2  ;;  %v422_v30 = vrot.slane %v421_v26, 1 }
  0xa4   : > { %v448_v33 = vadd.f32 %v447_v29, %v446_v27  ;;  %v423_v34 = vadd.f32 %v422_v30, %v421_v26 }
  0xa6   : > { %v449_v35 = vrot.slane %v448_v33, 1  ;;  %v434_v37 = vadd.f32 %v433_v31, %v423_v34 }
  0xa8   : > { %v450_v38 = vadd.f32 %v449_v35, %v448_v33  ;;  %436 = vst.msk [vmem:[%s337_s26] sm:$0x1] %vm435_vm4, %v434_v37 }
  0xa9   : > { %711 = shalt.err (!%p708_p3)
}
  0xaa   : > { %s712_s24 = scalar_lea.hbm %s956_s30, 16  ;;  %s716_s19 = scalar_lea.hbm %s1067_s8, 32 }
  0xab   : > { %p713_p4 = scmp.ne.s32.totalorder %s956_s30, %s712_s24  ;;  %p717_p9 = scmp.lt.s32.totalorder %s956_s30, %s1067_s8 }
  0xac   : > { %p718_p10 = scmp.lt.s32.totalorder %s716_s19, %s712_s24 }
  0xad   : > { %p714_p7 = pnand %p713_p4, %p918_p5 }
  0xae   : > { %p719_p11 = por %p718_p10, %p717_p9 }
  0xaf   : > { %p715_p8 = pneg %p714_p7 }
  0xb1   : > { %p720_p12 = pnand %p719_p11, %p715_p8 }
  0xb3   : > { %723 = shalt.err (!%p720_p12)
}
  0xb4   : > { %645 = dma.vmem_to_hbm [thread:$0]  (%p918_p5), %s958_s27, 16, %s956_s30, %s966_s12   ;;  %v461_v39 = vadd.f32 %v460_v36, %v450_v38 }
  0xb5   : > { %s1075_s6 = sshll.u32 %s899_s4, 4  ;;  %s1076_s10 = scalar_lea.vmem [#allocation8], %s946_s23 }
  0xb6   : > { %s509_s25 = scalar_lea.hbm %s1068_s9, %s1075_s6  ;;  %462 = vst.msk [vmem:[%s1076_s10] sm:$0x1] %vm435_vm4, %v461_v39  ;;  %s724_s29 = scalar_lea.vmem %s512_s11, 16 }
  0xb7   : > { %p725_p13 = scmp.ne.s32.totalorder %s512_s11, %s724_s29  ;;  %s820_s24 = smov [#allocation8]  }
  0xb8   : > { %s728_s26 = sshll.u32 %s820_s24, 4  ;;  %s729_s26 = int_to_ptr.vmem [resolvable:$false] %s728_s26 }
  0xb9   : > { %p726_p0 = pnand %p725_p13, %p918_p5  ;;  %s730_s19 = scalar_lea.vmem %s729_s26, 32 }
  0xba   : > { %p731_p2 = scmp.lt.s32.totalorder %s512_s11, %s729_s26  ;;  %p732_p3 = scmp.lt.s32.totalorder %s730_s19, %s724_s29 }
  0xbb   : > { %p727_p1 = pneg %p726_p0 }
  0xbc   : > { %p733_p4 = por %p732_p3, %p731_p2 }
  0xbe   : > { %p734_p7 = pnand %p733_p4, %p727_p1 }
  0xc0   : > { %737 = shalt.err (!%p734_p7)
}
  0xc1   : > { %s738_s27 = scalar_lea.hbm %s509_s25, 16  ;;  %s742_s18 = scalar_lea.hbm %s1068_s9, 32 }
  0xc2   : > { %p739_p8 = scmp.ne.s32.totalorder %s509_s25, %s738_s27  ;;  %p743_p11 = scmp.lt.s32.totalorder %s509_s25, %s1068_s9 }
  0xc3   : > { %p744_p12 = scmp.lt.s32.totalorder %s742_s18, %s738_s27 }
  0xc4   : > { %p740_p9 = pnand %p739_p8, %p918_p5 }
  0xc5   : > { %p745_p13 = por %p744_p12, %p743_p11 }
  0xc6   : > { %p741_p10 = pneg %p740_p9 }
  0xc8   : > { %p746_p0 = pnand %p745_p13, %p741_p10 }
  0xca   : > { %749 = shalt.err (!%p746_p0)
}
  0xcb   : > { %646 = dma.vmem_to_hbm [thread:$0]  (%p918_p5), %s512_s11, 16, %s509_s25, %s966_s12   ;;  %v356_v40 = vpop.permute.xlu1 %355  ;;  %vm407_vm5 = vcmask 125952  }
  0xcc   : > { %s627_s29 = sshll.u32 %s946_s23, 2  ;;  %s631_s24 = sshll.u32 %s899_s4, 6 }
  0xcd   : > { %s331_s26 = scalar_lea.vmem [#allocation4], %s627_s29  ;;  %s1016_s6 = scalar_lea.hbm %s1066_s7, %s631_s24 }
  0xce   : > { %s485_s19 = sshll.u32 %s331_s26, 4  ;;  %s464_s4 = scalar_lea.sflag [#allocation5], %s946_s23  ;;  %s1018_s19 = int_to_ptr.vmem [resolvable:$true] %s485_s19 }
  0xcf   : > { %s750_s11 = scalar_lea.vmem %s1018_s19, 64  ;;  %s821_s12 = smov [#allocation4]  }
  0xd0   : > { %p751_p1 = scmp.ne.s32.totalorder %s1018_s19, %s750_s11  ;;  %s754_s25 = sshll.u32 %s821_s12, 4  ;;  %s755_s25 = int_to_ptr.vmem [resolvable:$false] %s754_s25 }
  0xd1   : > { %s756_s18 = scalar_lea.vmem %s755_s25, 128  ;;  %p757_p4 = scmp.lt.s32.totalorder %s1018_s19, %s755_s25 }
  0xd2   : > { %p752_p2 = pnand %p751_p1, %p918_p5  ;;  %p758_p7 = scmp.lt.s32.totalorder %s756_s18, %s750_s11 }
  0xd4   : > { %p753_p3 = pneg %p752_p2  ;;  %p759_p8 = por %p758_p7, %p757_p4 }
  0xd6   : > { %p760_p9 = pnand %p759_p8, %p753_p3 }
  0xe3   : > { %v400_v41 = vpop.f32.mrf.mxu0 }
  0xe4   : > { %v401_v42 = vadd.f32 %v400_v41, %v356_v40 }
  0xe5   : > { %v642_v43 = vpop.f32.mrf.mxu0 }
  0xe6   : > { %v406_v44 = vpack.c.bf16 %v401_v42, %v401_v42 }
  0xe7   : > { %v403_v45 = vpop.f32.mrf.mxu0 }
  0xe8   : > { %408 = vst.msk [vmem:[%s331_s26] sm:$0xf] %vm407_vm5, %v406_v44 }
  0xe9   : > { %v643_v46 = vpop.f32.mrf.mxu0 }
  0xea   : > { %763 = shalt.err (!%p760_p9)
}
  0xeb   : > { %s764_s28 = scalar_lea.hbm %s1016_s6, 64  ;;  %s768_s29 = scalar_lea.hbm %s1066_s7, 128 }
  0xec   : > { %p765_p10 = scmp.ne.s32.totalorder %s1016_s6, %s764_s28  ;;  %p769_p13 = scmp.lt.s32.totalorder %s1016_s6, %s1066_s7 }
  0xed   : > { %p770_p0 = scmp.lt.s32.totalorder %s768_s29, %s764_s28 }
  0xee   : > { %p766_p11 = pnand %p765_p10, %p918_p5 }
  0xef   : > { %p771_p1 = por %p770_p0, %p769_p13 }
  0xf0   : > { %p767_p12 = pneg %p766_p11 }
  0xf2   : > { %p772_p2 = pnand %p771_p1, %p767_p12 }
  0xf4   : > { %775 = shalt.err (!%p772_p2)
}
  0xf5   : > { %644 = dma.vmem_to_hbm [thread:$0]  (%p918_p5), %s1018_s19, 64, %s1016_s6, %s464_s4  }
  0xf6 PF: > { %p660_p3 = scmp.ge.s32.totalorder %s814_s16, 2  ;;  %s523_s27 = sand.u32 1, %s802_s13  }
  0xf7   : > { %s524_s30 = scalar_lea.sflag [#allocation5], %s523_s27 }
  0xf8   : > { %p651_p4 = pnand %p660_p3, %p922_p6 }
  0xfa   : > { %p652_p7 = pneg %p651_p4 }
  0xfc   : > { %793 = dma.done.wait (%p652_p7), %s524_s30, 64  }
  0xfd   : > { %795 = vsyncadd (%p652_p7), %s524_s30, 4294967232  ;;  %s1077_s11 = sadd.s32 4294967294, %s814_s16  }
  0xfe   : > { %s532_s12 = sand.u32 1, %s1077_s11  }
  0xff   : > { %s533_s25 = scalar_lea.sflag [#allocation7], %s532_s12 }
 0x100   : > { %797 = dma.done.wait (%p652_p7), %s533_s25, 32  }
 0x101   : > { %799 = vsyncadd (%p652_p7), %s533_s25, 4294967264  ;;  %p27_p5 = scmp.ge.s32.totalorder %s903_s17, 4   ;;  %s1078_s13 = smov %s806_s14 }
 0x102   : > { %s1079_s14 = smov %s810_s15  ;;  %s1080_s15 = smov %s916_s20 }
 0x103   : > { %s1081_s16 = smov %s903_s17  ;;  %29 = sbr.rel (!%p27_p5) target bundleno = 8 (0x8), region = 115 }
 0x108   :  { %545 = vsyncpa [#allocation5], 1 }
 0x109   :  { %547 = vsyncpa [#allocation5 + $0x1], 1 }
 0x10a   :  { %548 = vsyncpa [#allocation7], 1 }
 0x10b   :  { %550 = vsyncpa [#allocation7 + $0x1], 1 }

</bundles_post_ra>
